<compile_context>
chip_gen: v5e
topology: v5e:2x2
jax: 0.10.0
libtpu: 0.0.40
codegen_flags: <defaults>
</compile_context>

<pallas_src>
import functools
from typing import NamedTuple

import jax
import jax.numpy as jnp
from jax.experimental import pallas as pl
from jax.experimental.pallas import tpu as pltpu


def _round_up(x, m):
    return ((x + m - 1) // m) * m


def _vmem_capacity_bytes():
    """Physical VMEM capacity; conservative 64 MiB fallback (v7x)."""
    try:
        get_info = getattr(pltpu, "get_tpu_info", None)
        if get_info is not None:
            cap = getattr(get_info(), "vmem_capacity_bytes", None)
            if cap:
                return int(cap)
    except Exception:
        pass
    return 64 << 20


class SAEPlan(NamedTuple):
    input_dim: int
    feature_dim: int
    d_in_p: int        # padded input dim (multiple of 128)
    d_feat_p: int      # padded feature dim (multiple of tf)
    tb_max: int        # max batch tile (rows)
    tf: int            # feature tile (lanes)
    vmem_limit: int    # bytes requested from Mosaic
    w_dtype: str       # weight / x compute dtype name
    out_dtype: str     # output dtype name (matches original x dtype)


def make_plan(input_dim, feature_dim, *,
              max_batch_tile=512, max_feature_tile=2048,
              x_dtype=jnp.float32, weight_dtype=jnp.bfloat16):
    """Derive VMEM-capacity-aware tile sizes once at model setup."""
    d_in_p = _round_up(input_dim, 128)
    d_feat_128 = _round_up(feature_dim, 128)

    wb = jnp.dtype(weight_dtype).itemsize   # weights and the pre-cast x tile
    ob = jnp.dtype(x_dtype).itemsize        # encoded output dtype

    cap = _vmem_capacity_bytes()
    budget = int(cap * 0.7)                 # leave headroom for compiler scratch

    def footprint(tb, tf):
        # Conservative: count every stream as double-buffered.
        return 2 * (tb * d_in_p * wb            # x tile
                    + d_in_p * tf * wb + tf * 4  # W_enc^T tile + b_enc
                    + tf * d_in_p * wb + d_in_p * 4  # W_dec^T tile + b_dec
                    + tb * tf * ob               # encoded out tile
                    + tb * d_in_p * 4)           # decoded out tile (f32)

    tb = max(128, _round_up(min(max_batch_tile, 4096), 16))
    while tb > 128 and footprint(tb, 128) > budget:
        tb //= 2

    if footprint(tb, d_feat_128) <= budget:
        # Fast path: whole (padded) weight matrices VMEM-resident.
        tf = d_feat_128
    else:
        tf_cap = min(_round_up(max_feature_tile, 128), d_feat_128)
        while tf_cap > 128 and footprint(tb, tf_cap) > budget:
            tf_cap -= 128
        tf_cap = max(tf_cap, 128)
        # Avoid padding-waste: largest multiple of 128 <= tf_cap dividing d_feat_128.
        tf = 128
        for cand in range(128, tf_cap + 1, 128):
            if d_feat_128 % cand == 0:
                tf = cand
    d_feat_p = _round_up(d_feat_128, tf)

    vmem_limit = int(min(cap, max(32 << 20,
                                  footprint(tb, tf) * 5 // 4 + (2 << 20))))

    return SAEPlan(input_dim=input_dim, feature_dim=feature_dim,
                   d_in_p=d_in_p, d_feat_p=d_feat_p,
                   tb_max=tb, tf=tf, vmem_limit=vmem_limit,
                   w_dtype=jnp.dtype(weight_dtype).name,
                   out_dtype=jnp.dtype(x_dtype).name)


def prepare_weights(plan, w_enc, b_enc, w_dec, b_dec):
    """One-time weight layout: transpose, cast, pad (NOT re-run per forward).

    w_enc: (feature_dim, input_dim)   PyTorch nn.Linear weight layout
    b_enc: (feature_dim,)
    w_dec: (input_dim, feature_dim)
    b_dec: (input_dim,)
    """
    wdt = jnp.dtype(plan.w_dtype)
    d_in, d_feat = plan.input_dim, plan.feature_dim
    pi, pf = plan.d_in_p - d_in, plan.d_feat_p - d_feat
    w_enc_t = jnp.pad(jnp.transpose(w_enc).astype(wdt), ((0, pi), (0, pf)))
    w_dec_t = jnp.pad(jnp.transpose(w_dec).astype(wdt), ((0, pf), (0, pi)))
    b_enc_2d = jnp.pad(b_enc.reshape(1, d_feat).astype(jnp.float32),
                       ((0, 0), (0, pf)))
    b_dec_2d = jnp.pad(b_dec.reshape(1, d_in).astype(jnp.float32),
                       ((0, 0), (0, pi)))
    return (w_enc_t, b_enc_2d, w_dec_t, b_dec_2d)


def _sae_kernel(x_ref, w_enc_ref, b_enc_ref, w_dec_ref, b_dec_ref,
                enc_out_ref, dec_out_ref):
    """One (batch tile, feature tile) step: encode slice + accumulate decode."""
    j = pl.program_id(1)

    # Encoder: relu(x @ W_enc^T[:, jf] + b_enc[jf]); f32 MXU accumulation.
    pre = jnp.dot(x_ref[...], w_enc_ref[...],
                  preferred_element_type=jnp.float32)        # (tb, tf) f32
    encoded = jnp.maximum(pre + b_enc_ref[...], 0.0)
    enc_out_ref[...] = encoded.astype(enc_out_ref.dtype)

    # Decoder partial product for this feature tile.
    partial = jnp.dot(encoded.astype(w_dec_ref.dtype), w_dec_ref[...],
                      preferred_element_type=jnp.float32)    # (tb, d_in_p) f32

    # Accumulate directly into the (batch-resident, f32) decoded output block.
    @pl.when(j == 0)
    def _():
        dec_out_ref[...] = partial + b_dec_ref[...]

    @pl.when(j > 0)
    def _():
        dec_out_ref[...] += partial


@functools.partial(jax.jit, static_argnames=("plan",))
def sae_forward(x, prepared, plan):
    """
    x:        (B, input_dim)
    prepared: output of prepare_weights(plan, ...)
    returns (encoded (B, feature_dim), decoded (B, input_dim)) in x's dtype.
    """
    w_enc_t, b_enc_2d, w_dec_t, b_dec_2d = prepared
    B, d_in = x.shape
    d_in_p, d_feat_p, tf = plan.d_in_p, plan.d_feat_p, plan.tf
    wdt = jnp.dtype(plan.w_dtype)
    out_dtype = jnp.dtype(plan.out_dtype)

    # Batch tile: >=128 rows (keeps the MXU fed), multiple of 16 (bf16 sublanes).
    tb = min(plan.tb_max, max(128, _round_up(B, 16)))
    B_p = _round_up(B, tb)
    # Prefer >=2 batch tiles so the "parallel" axis can shard across v7x's 2 TCs.
    if B_p // tb < 2 and tb >= 256:
        tb = _round_up(tb // 2, 16)
        B_p = _round_up(B, tb)

    # Pre-cast x to the MXU compute dtype (halves x HBM bytes for bf16 and
    # removes a per-feature-step cast inside the kernel).
    x_p = jnp.pad(x.astype(wdt), ((0, B_p - B), (0, d_in_p - d_in)))

    grid = (B_p // tb, d_feat_p // tf)

    enc_p, dec_p = pl.pallas_call(
        _sae_kernel,
        out_shape=(
            jax.ShapeDtypeStruct((B_p, d_feat_p), out_dtype),   # encoded
            jax.ShapeDtypeStruct((B_p, d_in_p), jnp.float32),   # decoded (f32 acc)
        ),
        grid_spec=pltpu.PrefetchScalarGridSpec(
            num_scalar_prefetch=0,
            grid=grid,
            in_specs=[
                pl.BlockSpec((tb, d_in_p), lambda i, j: (i, 0)),   # x tile
                pl.BlockSpec((d_in_p, tf), lambda i, j: (0, j)),   # W_enc^T tile
                pl.BlockSpec((1, tf), lambda i, j: (0, j)),        # b_enc tile
                pl.BlockSpec((tf, d_in_p), lambda i, j: (j, 0)),   # W_dec^T tile
                pl.BlockSpec((1, d_in_p), lambda i, j: (0, 0)),    # b_dec
            ],
            out_specs=[
                pl.BlockSpec((tb, tf), lambda i, j: (i, j)),       # encoded
                pl.BlockSpec((tb, d_in_p), lambda i, j: (i, 0)),   # decoded (resident over j)
            ],
        ),
        compiler_params=pltpu.CompilerParams(
            dimension_semantics=("parallel", "arbitrary"),
            vmem_limit_bytes=plan.vmem_limit,
        ),
    )(x_p, w_enc_t, b_enc_2d, w_dec_t, b_dec_2d)

    encoded = enc_p[:B, :plan.feature_dim]
    decoded = dec_p[:B, :d_in].astype(out_dtype)
    return encoded, decoded


def init_params(key, input_dim, feature_dim):
    """Deterministic init mirroring the PyTorch __init__ semantics."""
    k1, k2, k3 = jax.random.split(key, 3)
    # kaiming_normal_ (fan_in mode, gain sqrt(2)): std = sqrt(2 / fan_in)
    w_enc = jax.random.normal(k1, (feature_dim, input_dim), jnp.float32) * jnp.sqrt(
        2.0 / input_dim)
    w_dec = jax.random.normal(k2, (input_dim, feature_dim), jnp.float32) * jnp.sqrt(
        2.0 / feature_dim)
    # encoder.bias.data.fill_(-1.0)
    b_enc = jnp.full((feature_dim,), -1.0, jnp.float32)
    # decoder bias keeps nn.Linear default: U(-1/sqrt(fan_in), 1/sqrt(fan_in))
    bound = 1.0 / jnp.sqrt(feature_dim)
    b_dec = jax.random.uniform(k3, (input_dim,), jnp.float32, -bound, bound)
    return w_enc, b_enc, w_dec, b_dec


if __name__ == "__main__":
    # Small shapes consistent with the module (batch of activations).
    B, INPUT_DIM, FEATURE_DIM = 16, 128, 256

    key = jax.random.PRNGKey(0)
    kx, kp = jax.random.split(key)
    x = jax.random.normal(kx, (B, INPUT_DIM), jnp.float32)
    w_enc, b_enc, w_dec, b_dec = init_params(kp, INPUT_DIM, FEATURE_DIM)

    # Pure-JAX reference.
    enc_ref = jnp.maximum(x @ w_enc.T + b_enc, 0.0)
    dec_ref = enc_ref @ w_dec.T + b_dec

    # f32-weight path (strict correctness check).
    plan_f32 = make_plan(INPUT_DIM, FEATURE_DIM, weight_dtype=jnp.float32)
    prep_f32 = prepare_weights(plan_f32, w_enc, b_enc, w_dec, b_dec)
    enc32, dec32 = sae_forward(x, prep_f32, plan_f32)
    jax.block_until_ready((enc32, dec32))
    assert enc32.shape == (B, FEATURE_DIM) and dec32.shape == (B, INPUT_DIM)
    assert jnp.allclose(enc32, enc_ref, atol=1e-4, rtol=1e-4)
    assert jnp.allclose(dec32, dec_ref, atol=1e-4, rtol=1e-4)

    # Default bf16 weight/x path (f32 accumulation) — the fast production path.
    plan_bf = make_plan(INPUT_DIM, FEATURE_DIM)
    prep_bf = prepare_weights(plan_bf, w_enc, b_enc, w_dec, b_dec)
    enc_bf, dec_bf = sae_forward(x, prep_bf, plan_bf)
    jax.block_until_ready((enc_bf, dec_bf))
    assert jnp.allclose(enc_bf, enc_ref, atol=1e-1, rtol=1e-1)
    assert jnp.allclose(dec_bf, dec_ref, atol=1e-1, rtol=1e-1)

    print("KERNEL_OK")
</pallas_src>

<mosaic_0001>
module attributes {stable_mosaic.version = 11 : i64} {
  func.func @_sae_kernel(%arg0: i32, %arg1: i32, %arg2: memref<128x128xf32, #tpu.memory_space<vmem>>, %arg3: memref<128x256xf32, #tpu.memory_space<vmem>>, %arg4: memref<1x256xf32, #tpu.memory_space<vmem>>, %arg5: memref<256x128xf32, #tpu.memory_space<vmem>>, %arg6: memref<1x128xf32, #tpu.memory_space<vmem>>, %arg7: memref<128x256xf32, #tpu.memory_space<vmem>>, %arg8: memref<128x128xf32, #tpu.memory_space<vmem>>) attributes {dimension_semantics = [#tpu.dimension_semantics<parallel>, #tpu.dimension_semantics<arbitrary>], iteration_bounds = array<i64: 1, 1>, scalar_prefetch = 0 : i64, scratch_operands = 0 : i64, tpu.core_type = #tpu.core_type<tc>, window_params = [{transform_indices = @transform_0, window_bounds = array<i64: 128, 128>}, {transform_indices = @transform_1, window_bounds = array<i64: 128, 256>}, {transform_indices = @transform_2, window_bounds = array<i64: 1, 256>}, {transform_indices = @transform_3, window_bounds = array<i64: 256, 128>}, {pipeline_mode = #tpu.pipeline_mode<synchronous>, transform_indices = @transform_4, window_bounds = array<i64: 1, 128>}, {transform_indices = @transform_5, window_bounds = array<i64: 128, 256>}, {transform_indices = @transform_6, window_bounds = array<i64: 128, 128>}]} {
    %c0 = arith.constant 0 : index
    %c0_0 = arith.constant 0 : index
    %0 = vector.load %arg2[%c0, %c0_0] : memref<128x128xf32, #tpu.memory_space<vmem>>, vector<128x128xf32>
    %c0_1 = arith.constant 0 : index
    %c0_2 = arith.constant 0 : index
    %1 = vector.load %arg3[%c0_1, %c0_2] : memref<128x256xf32, #tpu.memory_space<vmem>>, vector<128x256xf32>
    %cst = arith.constant dense<0.000000e+00> : vector<128x256xf32>
    %2 = tpu.matmul %0, %1, %cst {dimension_numbers = #tpu.dot_dimension_numbers<[1], [0], [0], [1], [0, 0, 1, 1], [], []>} : vector<128x128xf32>, vector<128x256xf32>, vector<128x256xf32> -> vector<128x256xf32>
    %c0_3 = arith.constant 0 : index
    %c0_4 = arith.constant 0 : index
    %3 = vector.load %arg4[%c0_3, %c0_4] : memref<1x256xf32, #tpu.memory_space<vmem>>, vector<1x256xf32>
    %4 = vector.broadcast %3 : vector<1x256xf32> to vector<128x256xf32>
    %5 = arith.addf %2, %4 : vector<128x256xf32>
    %cst_5 = arith.constant 0.000000e+00 : f32
    %6 = vector.broadcast %cst_5 : f32 to vector<128x256xf32>
    %7 = arith.maximumf %5, %6 : vector<128x256xf32>
    %c0_6 = arith.constant 0 : index
    %c0_7 = arith.constant 0 : index
    %8 = vector.load %arg7[%c0_6, %c0_7] : memref<128x256xf32, #tpu.memory_space<vmem>>, vector<128x256xf32>
    tpu.vector_store %arg7[%c0_6, %c0_7], %7 {strides = array<i32>} : memref<128x256xf32, #tpu.memory_space<vmem>>, vector<128x256xf32>,
    %c0_8 = arith.constant 0 : index
    %c0_9 = arith.constant 0 : index
    %9 = vector.load %arg5[%c0_8, %c0_9] : memref<256x128xf32, #tpu.memory_space<vmem>>, vector<256x128xf32>
    %cst_10 = arith.constant dense<0.000000e+00> : vector<128x128xf32>
    %10 = tpu.matmul %7, %9, %cst_10 {dimension_numbers = #tpu.dot_dimension_numbers<[1], [0], [0], [1], [0, 0, 1, 1], [], []>} : vector<128x256xf32>, vector<256x128xf32>, vector<128x128xf32> -> vector<128x128xf32>
    %c0_i32 = arith.constant 0 : i32
    %11 = arith.cmpi eq, %arg1, %c0_i32 : i32
    %12 = arith.extui %11 : i1 to i32
    %c0_i32_11 = arith.constant 0 : i32
    %13 = arith.cmpi ne, %12, %c0_i32_11 : i32
    scf.if %13 {
      %c0_14 = arith.constant 0 : index
      %c0_15 = arith.constant 0 : index
      %17 = vector.load %arg6[%c0_14, %c0_15] : memref<1x128xf32, #tpu.memory_space<vmem>>, vector<1x128xf32>
      %18 = vector.broadcast %17 : vector<1x128xf32> to vector<128x128xf32>
      %19 = arith.addf %10, %18 : vector<128x128xf32>
      %c0_16 = arith.constant 0 : index
      %c0_17 = arith.constant 0 : index
      %20 = vector.load %arg8[%c0_16, %c0_17] : memref<128x128xf32, #tpu.memory_space<vmem>>, vector<128x128xf32>
      tpu.vector_store %arg8[%c0_16, %c0_17], %19 {strides = array<i32>} : memref<128x128xf32, #tpu.memory_space<vmem>>, vector<128x128xf32>,
    } else {
    }
    %c0_i32_12 = arith.constant 0 : i32
    %14 = arith.cmpi sgt, %arg1, %c0_i32_12 : i32
    %15 = arith.extui %14 : i1 to i32
    %c0_i32_13 = arith.constant 0 : i32
    %16 = arith.cmpi ne, %15, %c0_i32_13 : i32
    scf.if %16 {
      %c0_14 = arith.constant 0 : index
      %c0_15 = arith.constant 0 : index
      %17 = vector.load %arg8[%c0_14, %c0_15] : memref<128x128xf32, #tpu.memory_space<vmem>>, vector<128x128xf32>
      %18 = arith.addf %17, %10 : vector<128x128xf32>
      %c0_16 = arith.constant 0 : index
      %c0_17 = arith.constant 0 : index
      %19 = vector.load %arg8[%c0_16, %c0_17] : memref<128x128xf32, #tpu.memory_space<vmem>>, vector<128x128xf32>
      tpu.vector_store %arg8[%c0_16, %c0_17], %18 {strides = array<i32>} : memref<128x128xf32, #tpu.memory_space<vmem>>, vector<128x128xf32>,
    } else {
    }
    return
  }
  func.func @transform_0(%arg0: i32, %arg1: i32) -> (i32, i32) {
    %c0_i32 = arith.constant 0 : i32
    %c0_i32_0 = arith.constant 0 : i32
    return %arg0, %c0_i32 : i32, i32
  }
  func.func @transform_1(%arg0: i32, %arg1: i32) -> (i32, i32) {
    %c0_i32 = arith.constant 0 : i32
    %c0_i32_0 = arith.constant 0 : i32
    return %c0_i32, %arg1 : i32, i32
  }
  func.func @transform_2(%arg0: i32, %arg1: i32) -> (i32, i32) {
    %c0_i32 = arith.constant 0 : i32
    %c0_i32_0 = arith.constant 0 : i32
    return %c0_i32, %arg1 : i32, i32
  }
  func.func @transform_3(%arg0: i32, %arg1: i32) -> (i32, i32) {
    %c0_i32 = arith.constant 0 : i32
    %c0_i32_0 = arith.constant 0 : i32
    return %arg1, %c0_i32 : i32, i32
  }
  func.func @transform_4(%arg0: i32, %arg1: i32) -> (i32, i32) {
    %c0_i32 = arith.constant 0 : i32
    %c0_i32_0 = arith.constant 0 : i32
    %c0_i32_1 = arith.constant 0 : i32
    return %c0_i32, %c0_i32_0 : i32, i32
  }
  func.func @transform_5(%arg0: i32, %arg1: i32) -> (i32, i32) {
    %c0_i32 = arith.constant 0 : i32
    return %arg0, %arg1 : i32, i32
  }
  func.func @transform_6(%arg0: i32, %arg1: i32) -> (i32, i32) {
    %c0_i32 = arith.constant 0 : i32
    %c0_i32_0 = arith.constant 0 : i32
    return %arg0, %c0_i32 : i32, i32
  }
}

</mosaic_0001>

<bundles_post_ra>
// kernel: sae_forward.1
= control target key start
LH: loop header
LB: loop body
LE: loop exit
PB: predicated region body
PF: predicated region fallthrough
CT: control target
= control target key end

     0   :  { %12 = vsyncpa [#allocation3], 0  ;;  %s924_s0 = inlined_call_operand.vmem [shape: f32[128,128], index: 0, kind: input, shape index: {}]   ;;  %s925_s1 = inlined_call_operand.hbm [shape: f32[128,256], index: 1, kind: input, shape index: {}]   ;;  %s926_s2 = inlined_call_operand.vmem [shape: f32[1,256], index: 2, kind: input, shape index: {}]   ;;  %s927_s3 = inlined_call_operand.hbm [shape: f32[256,128], index: 3, kind: input, shape index: {}]   ;;  %s928_s4 = inlined_call_operand.vmem [shape: f32[1,128], index: 4, kind: input, shape index: {}]   ;;  %s929_s5 = inlined_call_operand.vmem [shape: f32[128,256], index: 5, kind: output, shape index: {0}]   ;;  %s930_s6 = inlined_call_operand.vmem [shape: f32[128,128], index: 6, kind: output, shape index: {1}]  }
   0x1   :  { %s20_s23 = sshll.u32 %s925_s1, 4  ;;  %s21_s23 = int_to_ptr.hbm [resolvable:$true] %s20_s23 }
   0x2   :  { %13 = vsyncpa [#allocation5], 0  ;;  %s625_s24 = smov [#allocation2]   ;;  %s35_s28 = sshll.u32 %s927_s3, 4  ;;  %s36_s28 = int_to_ptr.hbm [resolvable:$true] %s35_s28 }
   0x3   :  { %s22_s25 = sshll.u32 %s625_s24, 4  ;;  %s626_s29 = smov 256   ;;  %s23_s25 = int_to_ptr.vmem [resolvable:$true] %s22_s25 }
   0x4   :  { %s627_s30 = smov 16   ;;  %s628_s7 = smov [#allocation4]  }
   0x5   :  { %28 = dma.hbm_to_vmem [thread:$0]  %s21_s23, 4096, %s23_s25, [#allocation3], %s626_s29, %s626_s29, %s627_s30  }
   0x6   :  { %s37_s8 = sshll.u32 %s628_s7, 4  ;;  %s629_s9 = smov 128   ;;  %s38_s8 = int_to_ptr.vmem [resolvable:$true] %s37_s8 }
   0x7   :  { %s630_s10 = smov 8  }
   0x8   :  { %43 = dma.hbm_to_vmem [thread:$0]  %s36_s28, 4096, %s38_s8, [#allocation5], %s629_s9, %s629_s9, %s630_s10  }
   0x9   :  { %621 = dma.done.wait [#allocation3], 4096  }
   0xa   :  { %622 = vsyncadd [#allocation3], 4294963200 }
   0xb   :  { %623 = dma.done.wait [#allocation5], 4096  }
   0xc   :  { %624 = vsyncadd [#allocation5], 4294963200  ;;  %v100_v0 = vld [vmem:[#allocation2 + $0xf0] sm:$0xff]  ;;  %v101_v1 = vld [vmem:[#allocation2 + $0xf8] sm:$0xff] }
   0xd   :  { %v98_v2 = vld [vmem:[#allocation2 + $0xe0] sm:$0xff]  ;;  %108 = vmatpush.msra.mxu0 %v100_v0  ;;  %173 = vmatpush.msra.mxu1 %v101_v1  ;;  %v99_v3 = vld [vmem:[#allocation2 + $0xe8] sm:$0xff]  ;;  %v96_v4 = vld [vmem:[#allocation2 + $0xd0] sm:$0xff] }
   0xe   :  { %v97_v5 = vld [vmem:[#allocation2 + $0xd8] sm:$0xff]  ;;  %v94_v6 = vld [vmem:[#allocation2 + $0xc0] sm:$0xff]  ;;  %v95_v7 = vld [vmem:[#allocation2 + $0xc8] sm:$0xff] }
   0xf   :  { %109 = vmatpush.msra.mxu0 %v98_v2  ;;  %174 = vmatpush.msra.mxu1 %v99_v3  ;;  %v92_v8 = vld [vmem:[#allocation2 + $0xb0] sm:$0xff]  ;;  %v93_v9 = vld [vmem:[#allocation2 + $0xb8] sm:$0xff]  ;;  %v90_v10 = vld [vmem:[#allocation2 + $0xa0] sm:$0xff] }
  0x10   :  { %v91_v11 = vld [vmem:[#allocation2 + $0xa8] sm:$0xff]  ;;  %v88_v12 = vld [vmem:[#allocation2 + $0x90] sm:$0xff]  ;;  %v89_v13 = vld [vmem:[#allocation2 + $0x98] sm:$0xff] }
  0x11   :  { %110 = vmatpush.msra.mxu0 %v96_v4  ;;  %175 = vmatpush.msra.mxu1 %v97_v5  ;;  %v86_v14 = vld [vmem:[#allocation2 + $0x80] sm:$0xff]  ;;  %v87_v15 = vld [vmem:[#allocation2 + $0x88] sm:$0xff]  ;;  %v84_v16 = vld [vmem:[#allocation2 + $0x70] sm:$0xff] }
  0x12   :  { %v85_v17 = vld [vmem:[#allocation2 + $0x78] sm:$0xff]  ;;  %v82_v18 = vld [vmem:[#allocation2 + $0x60] sm:$0xff]  ;;  %v83_v19 = vld [vmem:[#allocation2 + $0x68] sm:$0xff] }
  0x13   :  { %111 = vmatpush.msra.mxu0 %v94_v6  ;;  %176 = vmatpush.msra.mxu1 %v95_v7  ;;  %v80_v20 = vld [vmem:[#allocation2 + $0x50] sm:$0xff]  ;;  %v81_v21 = vld [vmem:[#allocation2 + $0x58] sm:$0xff]  ;;  %v78_v22 = vld [vmem:[#allocation2 + $0x40] sm:$0xff] }
  0x14   :  { %v79_v23 = vld [vmem:[#allocation2 + $0x48] sm:$0xff]  ;;  %v76_v24 = vld [vmem:[#allocation2 + $0x30] sm:$0xff]  ;;  %v77_v25 = vld [vmem:[#allocation2 + $0x38] sm:$0xff] }
  0x15   :  { %112 = vmatpush.msra.mxu0 %v92_v8  ;;  %177 = vmatpush.msra.mxu1 %v93_v9  ;;  %v74_v26 = vld [vmem:[#allocation2 + $0x20] sm:$0xff]  ;;  %v75_v27 = vld [vmem:[#allocation2 + $0x28] sm:$0xff]  ;;  %v72_v28 = vld [vmem:[#allocation2 + $0x10] sm:$0xff] }
  0x16   :  { %v73_v29 = vld [vmem:[#allocation2 + $0x18] sm:$0xff]  ;;  %v70_v30 = vld [vmem:[#allocation2] sm:$0xff]  ;;  %v71_v31 = vld [vmem:[#allocation2 + $0x8] sm:$0xff] }
  0x17   :  { %113 = vmatpush.msra.mxu0 %v90_v10  ;;  %178 = vmatpush.msra.mxu1 %v91_v11  ;;  %v54_v32 = vld [vmem:[%s924_s0] sm:$0xff]  ;;  %v55_v33 = vld [vmem:[%s924_s0 + $0x8] sm:$0xff]  ;;  %v56_v34 = vld [vmem:[%s924_s0 + $0x10] sm:$0xff] }
  0x18   :  { %v57_v35 = vld [vmem:[%s924_s0 + $0x18] sm:$0xff]  ;;  %v58_v36 = vld [vmem:[%s924_s0 + $0x20] sm:$0xff]  ;;  %v59_v37 = vld [vmem:[%s924_s0 + $0x28] sm:$0xff] }
  0x19   :  { %114 = vmatpush.msra.mxu0 %v88_v12  ;;  %179 = vmatpush.msra.mxu1 %v89_v13  ;;  %v60_v38 = vld [vmem:[%s924_s0 + $0x30] sm:$0xff]  ;;  %v61_v39 = vld [vmem:[%s924_s0 + $0x38] sm:$0xff]  ;;  %v62_v40 = vld [vmem:[%s924_s0 + $0x40] sm:$0xff] }
  0x1a   :  { %v317_v41 = vld [vmem:[#allocation4 + $0x78] sm:$0xff]  ;;  %v316_v43 = vld [vmem:[#allocation4 + $0x70] sm:$0xff]  ;;  %v315_v45 = vld [vmem:[#allocation4 + $0x68] sm:$0xff] }
  0x1b   :  { %115 = vmatpush.msra.mxu0 %v86_v14  ;;  %180 = vmatpush.msra.mxu1 %v87_v15  ;;  %v333_v42 = vld [vmem:[#allocation4 + $0xf8] sm:$0xff]  ;;  %v332_v44 = vld [vmem:[#allocation4 + $0xf0] sm:$0xff]  ;;  %v331_v46 = vld [vmem:[#allocation4 + $0xe8] sm:$0xff] }
  0x1c   :  { %334 = vmatpush.msra.mxu2 %v317_v41  ;;  %399 = vmatpush.msra.mxu3 %v333_v42  ;;  %v63_v47 = vld [vmem:[%s924_s0 + $0x48] sm:$0xff]  ;;  %v314_v48 = vld [vmem:[#allocation4 + $0x60] sm:$0xff]  ;;  %v313_v50 = vld [vmem:[#allocation4 + $0x58] sm:$0xff] }
  0x1d   :  { %116 = vmatpush.msra.mxu0 %v84_v16  ;;  %181 = vmatpush.msra.mxu1 %v85_v17  ;;  %v330_v49 = vld [vmem:[#allocation4 + $0xe0] sm:$0xff]  ;;  %v329_v51 = vld [vmem:[#allocation4 + $0xd8] sm:$0xff]  ;;  %v312_v52 = vld [vmem:[#allocation4 + $0x50] sm:$0xff] }
  0x1e   :  { %335 = vmatpush.msra.mxu2 %v316_v43  ;;  %400 = vmatpush.msra.mxu3 %v332_v44  ;;  %v328_v53 = vld [vmem:[#allocation4 + $0xd0] sm:$0xff]  ;;  %v311_v54 = vld [vmem:[#allocation4 + $0x48] sm:$0xff]  ;;  %v310_v57 = vld [vmem:[#allocation4 + $0x40] sm:$0xff] }
  0x1f   :  { %117 = vmatpush.msra.mxu0 %v82_v18  ;;  %182 = vmatpush.msra.mxu1 %v83_v19  ;;  %v327_v55 = vld [vmem:[#allocation4 + $0xc8] sm:$0xff]  ;;  %v64_v56 = vld [vmem:[%s924_s0 + $0x50] sm:$0xff]  ;;  %v326_v58 = vld [vmem:[#allocation4 + $0xc0] sm:$0xff] }
  0x20   :  { %336 = vmatpush.msra.mxu2 %v315_v45  ;;  %401 = vmatpush.msra.mxu3 %v331_v46  ;;  %v309_v59 = vld [vmem:[#allocation4 + $0x38] sm:$0xff]  ;;  %v308_v61 = vld [vmem:[#allocation4 + $0x30] sm:$0xff]  ;;  %v307_v63 = vld [vmem:[#allocation4 + $0x28] sm:$0xff] }
  0x21   :  { %118 = vmatpush.msra.mxu0 %v80_v20  ;;  %183 = vmatpush.msra.mxu1 %v81_v21  ;;  %v325_v60 = vld [vmem:[#allocation4 + $0xb8] sm:$0xff]  ;;  %v324_v62 = vld [vmem:[#allocation4 + $0xb0] sm:$0xff]  ;;  %v323_v0 = vld [vmem:[#allocation4 + $0xa8] sm:$0xff] }
  0x22   :  { %337 = vmatpush.msra.mxu2 %v314_v48  ;;  %402 = vmatpush.msra.mxu3 %v330_v49  ;;  %v65_v1 = vld [vmem:[%s924_s0 + $0x58] sm:$0xff]  ;;  %v306_v2 = vld [vmem:[#allocation4 + $0x20] sm:$0xff]  ;;  %v304_v7 = vld [vmem:[#allocation4 + $0x10] sm:$0xff] }
  0x23   :  { %119 = vmatpush.msra.mxu0 %v78_v22  ;;  %184 = vmatpush.msra.mxu1 %v79_v23  ;;  %v322_v3 = vld [vmem:[#allocation4 + $0xa0] sm:$0xff]  ;;  %v305_v4 = vld [vmem:[#allocation4 + $0x18] sm:$0xff]  ;;  %v320_v8 = vld [vmem:[#allocation4 + $0x90] sm:$0xff] }
  0x24   :  { %338 = vmatpush.msra.mxu2 %v313_v50  ;;  %403 = vmatpush.msra.mxu3 %v329_v51  ;;  %v321_v5 = vld [vmem:[#allocation4 + $0x98] sm:$0xff]  ;;  %v66_v6 = vld [vmem:[%s924_s0 + $0x60] sm:$0xff]  ;;  %v303_v9 = vld [vmem:[#allocation4 + $0x8] sm:$0xff] }
  0x25   :  { %120 = vmatpush.msra.mxu0 %v76_v24  ;;  %185 = vmatpush.msra.mxu1 %v77_v25  ;;  %v319_v10 = vld [vmem:[#allocation4 + $0x88] sm:$0xff]  ;;  %v302_v11 = vld [vmem:[#allocation4] sm:$0xff]  ;;  %v68_v14 = vld [vmem:[%s924_s0 + $0x70] sm:$0xff] }
  0x26   :  { %339 = vmatpush.msra.mxu2 %v312_v52  ;;  %404 = vmatpush.msra.mxu3 %v328_v53  ;;  %v318_v12 = vld [vmem:[#allocation4 + $0x80] sm:$0xff]  ;;  %v67_v13 = vld [vmem:[%s924_s0 + $0x68] sm:$0xff]  ;;  %v69_v15 = vld [vmem:[%s924_s0 + $0x78] sm:$0xff] }
  0x27   :  { %121 = vmatpush.msra.mxu0 %v74_v26  ;;  %186 = vmatpush.msra.mxu1 %v75_v27  ;;  %v102_v16 = vld [vmem:[%s926_s2] sm:$0x3] }
  0x28   :  { %340 = vmatpush.msra.mxu2 %v311_v54  ;;  %405 = vmatpush.msra.mxu3 %v327_v55  ;;  %v723_v17 = vperm.slane %v102_v16, 0  ;;  %v725_v18 = vperm.slane %v102_v16, 1 }
  0x29   :  { %122 = vmatpush.msra.mxu0 %v72_v28  ;;  %187 = vmatpush.msra.mxu1 %v73_v29 }
  0x2a   :  { %341 = vmatpush.msra.mxu2 %v310_v57  ;;  %406 = vmatpush.msra.mxu3 %v326_v58 }
  0x2b   :  { %123 = vmatpush.msra.mxu0 %v70_v30  ;;  %188 = vmatpush.msra.mxu1 %v71_v31 }
  0x2c   :  { %124 = vmatmul.f32.vlgmr.msra.gmra.mxu0 %v54_v32  ;;  %189 = vmatmul.f32.vlgmr.msra.gmra.mxu1 %v54_v32 }
  0x2d   :  { %342 = vmatpush.msra.mxu2 %v309_v59  ;;  %407 = vmatpush.msra.mxu3 %v325_v60 }
  0x2f   :  { %343 = vmatpush.msra.mxu2 %v308_v61  ;;  %408 = vmatpush.msra.mxu3 %v324_v62 }
  0x31   :  { %344 = vmatpush.msra.mxu2 %v307_v63  ;;  %409 = vmatpush.msra.mxu3 %v323_v0 }
  0x33   :  { %345 = vmatpush.msra.mxu2 %v306_v2  ;;  %410 = vmatpush.msra.mxu3 %v322_v3 }
  0x34   :  { %127 = vmatmul.f32.gmra.mxu0 %v55_v33  ;;  %192 = vmatmul.f32.gmra.mxu1 %v55_v33 }
  0x35   :  { %346 = vmatpush.msra.mxu2 %v305_v4  ;;  %411 = vmatpush.msra.mxu3 %v321_v5 }
  0x37   :  { %347 = vmatpush.msra.mxu2 %v304_v7  ;;  %412 = vmatpush.msra.mxu3 %v320_v8 }
  0x39   :  { %348 = vmatpush.msra.mxu2 %v303_v9  ;;  %413 = vmatpush.msra.mxu3 %v319_v10 }
  0x3b   :  { %349 = vmatpush.msra.mxu2 %v302_v11  ;;  %414 = vmatpush.msra.mxu3 %v318_v12 }
  0x3c   :  { %130 = vmatmul.f32.gmra.mxu0 %v56_v34  ;;  %195 = vmatmul.f32.gmra.mxu1 %v56_v34 }
  0x44   :  { %133 = vmatmul.f32.gmra.mxu0 %v57_v35  ;;  %198 = vmatmul.f32.gmra.mxu1 %v57_v35 }
  0x4c   :  { %136 = vmatmul.f32.gmra.mxu0 %v58_v36  ;;  %201 = vmatmul.f32.gmra.mxu1 %v58_v36 }
  0x54   :  { %139 = vmatmul.f32.gmra.mxu0 %v59_v37  ;;  %204 = vmatmul.f32.gmra.mxu1 %v59_v37 }
  0x5c   :  { %142 = vmatmul.f32.gmra.mxu0 %v60_v38  ;;  %207 = vmatmul.f32.gmra.mxu1 %v60_v38 }
  0x64   :  { %145 = vmatmul.f32.gmra.mxu0 %v61_v39  ;;  %210 = vmatmul.f32.gmra.mxu1 %v61_v39 }
  0x6c   :  { %148 = vmatmul.f32.gmra.mxu0 %v62_v40  ;;  %213 = vmatmul.f32.gmra.mxu1 %v62_v40 }
  0x74   :  { %151 = vmatmul.f32.gmra.mxu0 %v63_v47  ;;  %216 = vmatmul.f32.gmra.mxu1 %v63_v47 }
  0x7c   :  { %154 = vmatmul.f32.gmra.mxu0 %v64_v56  ;;  %219 = vmatmul.f32.gmra.mxu1 %v64_v56 }
  0x84   :  { %157 = vmatmul.f32.gmra.mxu0 %v65_v1  ;;  %222 = vmatmul.f32.gmra.mxu1 %v65_v1 }
  0x8c   :  { %160 = vmatmul.f32.gmra.mxu0 %v66_v6  ;;  %225 = vmatmul.f32.gmra.mxu1 %v66_v6 }
  0x94   :  { %163 = vmatmul.f32.gmra.mxu0 %v67_v13  ;;  %228 = vmatmul.f32.gmra.mxu1 %v67_v13 }
  0x9c   :  { %166 = vmatmul.f32.gmra.mxu0 %v68_v14  ;;  %231 = vmatmul.f32.gmra.mxu1 %v68_v14 }
  0xa4   :  { %169 = vmatmul.f32.gmra.mxu0 %v69_v15  ;;  %234 = vmatmul.f32.gmra.mxu1 %v69_v15 }
  0xa9   :  { %v125_v19 = vpop.f32.mrf.mxu0  ;;  %v190_v20 = vpop.f32.mrf.mxu1 }
  0xaa   :  { %v126_v21 = vadd.f32 %v125_v19, %v723_v17  ;;  %v191_v22 = vadd.f32 %v190_v20, %v725_v18 }
  0xac   :  { %v238_v23 = vmax.f32 %v126_v21, 0.0  ;;  %v239_v24 = vmax.f32 %v191_v22, 0.0 }
  0xae   :  { %270 = vst [vmem:[%s929_s5] sm:$0xff] %v238_v23  ;;  %350 = vmatmul.f32.vlgmr.msra.gmra.mxu2 %v238_v23  ;;  %415 = vmatmul.f32.vlgmr.msra.gmra.mxu3 %v239_v24 }
  0xaf   :  { %271 = vst [vmem:[%s929_s5 + $0x8] sm:$0xff] %v239_v24 }
  0xb1   :  { %v128_v25 = vpop.f32.mrf.mxu0  ;;  %v193_v26 = vpop.f32.mrf.mxu1 }
  0xb2   :  { %v129_v27 = vadd.f32 %v128_v25, %v723_v17  ;;  %v194_v28 = vadd.f32 %v193_v26, %v725_v18 }
  0xb4   :  { %v240_v29 = vmax.f32 %v129_v27, 0.0  ;;  %v241_v30 = vmax.f32 %v194_v28, 0.0 }
  0xb6   :  { %272 = vst [vmem:[%s929_s5 + $0x10] sm:$0xff] %v240_v29  ;;  %353 = vmatmul.f32.gmra.mxu2 %v240_v29  ;;  %418 = vmatmul.f32.gmra.mxu3 %v241_v30 }
  0xb7   :  { %273 = vst [vmem:[%s929_s5 + $0x18] sm:$0xff] %v241_v30 }
  0xb9   :  { %v131_v31 = vpop.f32.mrf.mxu0  ;;  %v196_v32 = vpop.f32.mrf.mxu1 }
  0xba   :  { %v132_v33 = vadd.f32 %v131_v31, %v723_v17  ;;  %v197_v34 = vadd.f32 %v196_v32, %v725_v18 }
  0xbc   :  { %v242_v35 = vmax.f32 %v132_v33, 0.0  ;;  %v243_v36 = vmax.f32 %v197_v34, 0.0 }
  0xbe   :  { %274 = vst [vmem:[%s929_s5 + $0x20] sm:$0xff] %v242_v35  ;;  %356 = vmatmul.f32.gmra.mxu2 %v242_v35  ;;  %421 = vmatmul.f32.gmra.mxu3 %v243_v36 }
  0xbf   :  { %275 = vst [vmem:[%s929_s5 + $0x28] sm:$0xff] %v243_v36 }
  0xc1   :  { %v134_v37 = vpop.f32.mrf.mxu0  ;;  %v199_v38 = vpop.f32.mrf.mxu1 }
  0xc2   :  { %v135_v39 = vadd.f32 %v134_v37, %v723_v17  ;;  %v200_v40 = vadd.f32 %v199_v38, %v725_v18 }
  0xc4   :  { %v244_v41 = vmax.f32 %v135_v39, 0.0  ;;  %v245_v42 = vmax.f32 %v200_v40, 0.0 }
  0xc6   :  { %276 = vst [vmem:[%s929_s5 + $0x30] sm:$0xff] %v244_v41  ;;  %359 = vmatmul.f32.gmra.mxu2 %v244_v41  ;;  %424 = vmatmul.f32.gmra.mxu3 %v245_v42 }
  0xc7   :  { %277 = vst [vmem:[%s929_s5 + $0x38] sm:$0xff] %v245_v42 }
  0xc9   :  { %v137_v43 = vpop.f32.mrf.mxu0  ;;  %v202_v44 = vpop.f32.mrf.mxu1 }
  0xca   :  { %v138_v45 = vadd.f32 %v137_v43, %v723_v17  ;;  %v203_v46 = vadd.f32 %v202_v44, %v725_v18 }
  0xcc   :  { %v246_v47 = vmax.f32 %v138_v45, 0.0  ;;  %v247_v48 = vmax.f32 %v203_v46, 0.0 }
  0xce   :  { %278 = vst [vmem:[%s929_s5 + $0x40] sm:$0xff] %v246_v47  ;;  %362 = vmatmul.f32.gmra.mxu2 %v246_v47  ;;  %427 = vmatmul.f32.gmra.mxu3 %v247_v48 }
  0xcf   :  { %279 = vst [vmem:[%s929_s5 + $0x48] sm:$0xff] %v247_v48 }
  0xd1   :  { %v140_v49 = vpop.f32.mrf.mxu0  ;;  %v205_v50 = vpop.f32.mrf.mxu1 }
  0xd2   :  { %v141_v51 = vadd.f32 %v140_v49, %v723_v17  ;;  %v206_v52 = vadd.f32 %v205_v50, %v725_v18 }
  0xd4   :  { %v248_v53 = vmax.f32 %v141_v51, 0.0  ;;  %v249_v54 = vmax.f32 %v206_v52, 0.0 }
  0xd6   :  { %280 = vst [vmem:[%s929_s5 + $0x50] sm:$0xff] %v248_v53  ;;  %365 = vmatmul.f32.gmra.mxu2 %v248_v53  ;;  %430 = vmatmul.f32.gmra.mxu3 %v249_v54  ;;  %v858_v53 = vld [vmem:[%s928_s4] ss:$0 sm:$0xff] }
  0xd7   :  { %281 = vst [vmem:[%s929_s5 + $0x58] sm:$0xff] %v249_v54 }
  0xd9   :  { %v143_v55 = vpop.f32.mrf.mxu0  ;;  %v208_v56 = vpop.f32.mrf.mxu1 }
  0xda   :  { %v144_v57 = vadd.f32 %v143_v55, %v723_v17  ;;  %v209_v58 = vadd.f32 %v208_v56, %v725_v18 }
  0xdc   :  { %v250_v59 = vmax.f32 %v144_v57, 0.0  ;;  %v251_v60 = vmax.f32 %v209_v58, 0.0 }
  0xde   :  { %282 = vst [vmem:[%s929_s5 + $0x60] sm:$0xff] %v250_v59  ;;  %368 = vmatmul.f32.gmra.mxu2 %v250_v59  ;;  %433 = vmatmul.f32.gmra.mxu3 %v251_v60 }
  0xdf   :  { %283 = vst [vmem:[%s929_s5 + $0x68] sm:$0xff] %v251_v60 }
  0xe1   :  { %v146_v61 = vpop.f32.mrf.mxu0  ;;  %v211_v62 = vpop.f32.mrf.mxu1 }
  0xe2   :  { %v147_v63 = vadd.f32 %v146_v61, %v723_v17  ;;  %v212_v0 = vadd.f32 %v211_v62, %v725_v18 }
  0xe4   :  { %v252_v1 = vmax.f32 %v147_v63, 0.0  ;;  %v253_v2 = vmax.f32 %v212_v0, 0.0 }
  0xe6   :  { %284 = vst [vmem:[%s929_s5 + $0x70] sm:$0xff] %v252_v1  ;;  %371 = vmatmul.f32.gmra.mxu2 %v252_v1  ;;  %436 = vmatmul.f32.gmra.mxu3 %v253_v2 }
  0xe7   :  { %285 = vst [vmem:[%s929_s5 + $0x78] sm:$0xff] %v253_v2 }
  0xe9   :  { %v149_v3 = vpop.f32.mrf.mxu0  ;;  %v214_v4 = vpop.f32.mrf.mxu1 }
  0xea   :  { %v150_v5 = vadd.f32 %v149_v3, %v723_v17  ;;  %v215_v6 = vadd.f32 %v214_v4, %v725_v18 }
  0xec   :  { %v254_v7 = vmax.f32 %v150_v5, 0.0  ;;  %v255_v8 = vmax.f32 %v215_v6, 0.0 }
  0xee   :  { %286 = vst [vmem:[%s929_s5 + $0x80] sm:$0xff] %v254_v7  ;;  %374 = vmatmul.f32.gmra.mxu2 %v254_v7  ;;  %439 = vmatmul.f32.gmra.mxu3 %v255_v8 }
  0xef   :  { %287 = vst [vmem:[%s929_s5 + $0x88] sm:$0xff] %v255_v8 }
  0xf1   :  { %v152_v9 = vpop.f32.mrf.mxu0  ;;  %v217_v10 = vpop.f32.mrf.mxu1 }
  0xf2   :  { %v153_v11 = vadd.f32 %v152_v9, %v723_v17  ;;  %v218_v12 = vadd.f32 %v217_v10, %v725_v18 }
  0xf4   :  { %v256_v13 = vmax.f32 %v153_v11, 0.0  ;;  %v257_v14 = vmax.f32 %v218_v12, 0.0 }
  0xf6   :  { %288 = vst [vmem:[%s929_s5 + $0x90] sm:$0xff] %v256_v13  ;;  %377 = vmatmul.f32.gmra.mxu2 %v256_v13  ;;  %442 = vmatmul.f32.gmra.mxu3 %v257_v14 }
  0xf7   :  { %289 = vst [vmem:[%s929_s5 + $0x98] sm:$0xff] %v257_v14 }
  0xf9   :  { %v155_v15 = vpop.f32.mrf.mxu0  ;;  %v220_v16 = vpop.f32.mrf.mxu1 }
  0xfa   :  { %v156_v19 = vadd.f32 %v155_v15, %v723_v17  ;;  %v221_v20 = vadd.f32 %v220_v16, %v725_v18 }
  0xfc   :  { %v258_v21 = vmax.f32 %v156_v19, 0.0  ;;  %v259_v22 = vmax.f32 %v221_v20, 0.0 }
  0xfe   :  { %290 = vst [vmem:[%s929_s5 + $0xa0] sm:$0xff] %v258_v21  ;;  %380 = vmatmul.f32.gmra.mxu2 %v258_v21  ;;  %445 = vmatmul.f32.gmra.mxu3 %v259_v22 }
  0xff   :  { %291 = vst [vmem:[%s929_s5 + $0xa8] sm:$0xff] %v259_v22 }
 0x101   :  { %v158_v23 = vpop.f32.mrf.mxu0  ;;  %v223_v24 = vpop.f32.mrf.mxu1 }
 0x102   :  { %v159_v25 = vadd.f32 %v158_v23, %v723_v17  ;;  %v224_v26 = vadd.f32 %v223_v24, %v725_v18 }
 0x104   :  { %v260_v27 = vmax.f32 %v159_v25, 0.0  ;;  %v261_v28 = vmax.f32 %v224_v26, 0.0 }
 0x106   :  { %292 = vst [vmem:[%s929_s5 + $0xb0] sm:$0xff] %v260_v27  ;;  %383 = vmatmul.f32.gmra.mxu2 %v260_v27  ;;  %448 = vmatmul.f32.gmra.mxu3 %v261_v28 }
 0x107   :  { %293 = vst [vmem:[%s929_s5 + $0xb8] sm:$0xff] %v261_v28 }
 0x109   :  { %v161_v29 = vpop.f32.mrf.mxu0  ;;  %v226_v30 = vpop.f32.mrf.mxu1 }
 0x10a   :  { %v162_v31 = vadd.f32 %v161_v29, %v723_v17  ;;  %v227_v32 = vadd.f32 %v226_v30, %v725_v18 }
 0x10c   :  { %v262_v33 = vmax.f32 %v162_v31, 0.0  ;;  %v263_v34 = vmax.f32 %v227_v32, 0.0 }
 0x10e   :  { %294 = vst [vmem:[%s929_s5 + $0xc0] sm:$0xff] %v262_v33  ;;  %386 = vmatmul.f32.gmra.mxu2 %v262_v33  ;;  %451 = vmatmul.f32.gmra.mxu3 %v263_v34 }
 0x10f   :  { %295 = vst [vmem:[%s929_s5 + $0xc8] sm:$0xff] %v263_v34 }
 0x111   :  { %v164_v35 = vpop.f32.mrf.mxu0  ;;  %v229_v36 = vpop.f32.mrf.mxu1 }
 0x112   :  { %v165_v37 = vadd.f32 %v164_v35, %v723_v17  ;;  %v230_v38 = vadd.f32 %v229_v36, %v725_v18 }
 0x114   :  { %v264_v39 = vmax.f32 %v165_v37, 0.0  ;;  %v265_v40 = vmax.f32 %v230_v38, 0.0 }
 0x116   :  { %296 = vst [vmem:[%s929_s5 + $0xd0] sm:$0xff] %v264_v39  ;;  %389 = vmatmul.f32.gmra.mxu2 %v264_v39  ;;  %454 = vmatmul.f32.gmra.mxu3 %v265_v40 }
 0x117   :  { %297 = vst [vmem:[%s929_s5 + $0xd8] sm:$0xff] %v265_v40 }
 0x119   :  { %v167_v41 = vpop.f32.mrf.mxu0  ;;  %v232_v42 = vpop.f32.mrf.mxu1 }
 0x11a   :  { %v168_v43 = vadd.f32 %v167_v41, %v723_v17  ;;  %v233_v44 = vadd.f32 %v232_v42, %v725_v18 }
 0x11c   :  { %v266_v45 = vmax.f32 %v168_v43, 0.0  ;;  %v267_v46 = vmax.f32 %v233_v44, 0.0 }
 0x11e   :  { %298 = vst [vmem:[%s929_s5 + $0xe0] sm:$0xff] %v266_v45  ;;  %392 = vmatmul.f32.gmra.mxu2 %v266_v45  ;;  %457 = vmatmul.f32.gmra.mxu3 %v267_v46 }
 0x11f   :  { %299 = vst [vmem:[%s929_s5 + $0xe8] sm:$0xff] %v267_v46 }
 0x121   :  { %v170_v47 = vpop.f32.mrf.mxu0  ;;  %v235_v48 = vpop.f32.mrf.mxu1 }
 0x122   :  { %v171_v49 = vadd.f32 %v170_v47, %v723_v17  ;;  %v236_v50 = vadd.f32 %v235_v48, %v725_v18 }
 0x124   :  { %v268_v51 = vmax.f32 %v171_v49, 0.0  ;;  %v269_v52 = vmax.f32 %v236_v50, 0.0 }
 0x126   :  { %300 = vst [vmem:[%s929_s5 + $0xf0] sm:$0xff] %v268_v51  ;;  %395 = vmatmul.f32.gmra.mxu2 %v268_v51  ;;  %460 = vmatmul.f32.gmra.mxu3 %v269_v52 }
 0x127   :  { %301 = vst [vmem:[%s929_s5 + $0xf8] sm:$0xff] %v269_v52 }
 0x131   :  { %v351_v17 = vpop.f32.mrf.mxu2  ;;  %v416_v54 = vpop.f32.mrf.mxu3 }
 0x132   :  { %v417_v18 = vadd.f32 %v416_v54, %v351_v17 }
 0x134   :  { %v472_v55 = vadd.f32 %v858_v53, %v417_v18 }
 0x136   :  { %488 = vst [vmem:[%s930_s6] sm:$0xff] %v472_v55 }
 0x139   :  { %v354_v56 = vpop.f32.mrf.mxu2  ;;  %v419_v57 = vpop.f32.mrf.mxu3 }
 0x13a   :  { %v420_v58 = vadd.f32 %v419_v57, %v354_v56 }
 0x13c   :  { %v473_v59 = vadd.f32 %v858_v53, %v420_v58 }
 0x13e   :  { %489 = vst [vmem:[%s930_s6 + $0x8] sm:$0xff] %v473_v59 }
 0x141   :  { %v357_v60 = vpop.f32.mrf.mxu2  ;;  %v422_v61 = vpop.f32.mrf.mxu3 }
 0x142   :  { %v423_v62 = vadd.f32 %v422_v61, %v357_v60 }
 0x144   :  { %v474_v63 = vadd.f32 %v858_v53, %v423_v62 }
 0x146   :  { %490 = vst [vmem:[%s930_s6 + $0x10] sm:$0xff] %v474_v63 }
 0x149   :  { %v360_v0 = vpop.f32.mrf.mxu2  ;;  %v425_v1 = vpop.f32.mrf.mxu3 }
 0x14a   :  { %v426_v2 = vadd.f32 %v425_v1, %v360_v0 }
 0x14c   :  { %v475_v3 = vadd.f32 %v858_v53, %v426_v2 }
 0x14e   :  { %491 = vst [vmem:[%s930_s6 + $0x18] sm:$0xff] %v475_v3 }
 0x151   :  { %v363_v4 = vpop.f32.mrf.mxu2  ;;  %v428_v5 = vpop.f32.mrf.mxu3 }
 0x152   :  { %v429_v6 = vadd.f32 %v428_v5, %v363_v4 }
 0x154   :  { %v476_v7 = vadd.f32 %v858_v53, %v429_v6 }
 0x156   :  { %492 = vst [vmem:[%s930_s6 + $0x20] sm:$0xff] %v476_v7 }
 0x159   :  { %v366_v8 = vpop.f32.mrf.mxu2  ;;  %v431_v9 = vpop.f32.mrf.mxu3 }
 0x15a   :  { %v432_v10 = vadd.f32 %v431_v9, %v366_v8 }
 0x15c   :  { %v477_v11 = vadd.f32 %v858_v53, %v432_v10 }
 0x15e   :  { %493 = vst [vmem:[%s930_s6 + $0x28] sm:$0xff] %v477_v11 }
 0x161   :  { %v369_v12 = vpop.f32.mrf.mxu2  ;;  %v434_v13 = vpop.f32.mrf.mxu3 }
 0x162   :  { %v435_v14 = vadd.f32 %v434_v13, %v369_v12 }
 0x164   :  { %v478_v15 = vadd.f32 %v858_v53, %v435_v14 }
 0x166   :  { %494 = vst [vmem:[%s930_s6 + $0x30] sm:$0xff] %v478_v15 }
 0x169   :  { %v372_v16 = vpop.f32.mrf.mxu2  ;;  %v437_v19 = vpop.f32.mrf.mxu3 }
 0x16a   :  { %v438_v20 = vadd.f32 %v437_v19, %v372_v16 }
 0x16c   :  { %v479_v21 = vadd.f32 %v858_v53, %v438_v20 }
 0x16e   :  { %495 = vst [vmem:[%s930_s6 + $0x38] sm:$0xff] %v479_v21 }
 0x171   :  { %v375_v22 = vpop.f32.mrf.mxu2  ;;  %v440_v23 = vpop.f32.mrf.mxu3 }
 0x172   :  { %v441_v24 = vadd.f32 %v440_v23, %v375_v22 }
 0x174   :  { %v480_v25 = vadd.f32 %v858_v53, %v441_v24 }
 0x176   :  { %496 = vst [vmem:[%s930_s6 + $0x40] sm:$0xff] %v480_v25 }
 0x179   :  { %v378_v26 = vpop.f32.mrf.mxu2  ;;  %v443_v27 = vpop.f32.mrf.mxu3 }
 0x17a   :  { %v444_v28 = vadd.f32 %v443_v27, %v378_v26 }
 0x17c   :  { %v481_v29 = vadd.f32 %v858_v53, %v444_v28 }
 0x17e   :  { %497 = vst [vmem:[%s930_s6 + $0x48] sm:$0xff] %v481_v29 }
 0x181   :  { %v381_v30 = vpop.f32.mrf.mxu2  ;;  %v446_v31 = vpop.f32.mrf.mxu3 }
 0x182   :  { %v447_v32 = vadd.f32 %v446_v31, %v381_v30 }
 0x184   :  { %v482_v33 = vadd.f32 %v858_v53, %v447_v32 }
 0x186   :  { %498 = vst [vmem:[%s930_s6 + $0x50] sm:$0xff] %v482_v33 }
 0x189   :  { %v384_v34 = vpop.f32.mrf.mxu2  ;;  %v449_v35 = vpop.f32.mrf.mxu3 }
 0x18a   :  { %v450_v36 = vadd.f32 %v449_v35, %v384_v34 }
 0x18c   :  { %v483_v37 = vadd.f32 %v858_v53, %v450_v36 }
 0x18e   :  { %499 = vst [vmem:[%s930_s6 + $0x58] sm:$0xff] %v483_v37 }
 0x191   :  { %v387_v38 = vpop.f32.mrf.mxu2  ;;  %v452_v39 = vpop.f32.mrf.mxu3 }
 0x192   :  { %v453_v40 = vadd.f32 %v452_v39, %v387_v38 }
 0x194   :  { %v484_v41 = vadd.f32 %v858_v53, %v453_v40 }
 0x196   :  { %500 = vst [vmem:[%s930_s6 + $0x60] sm:$0xff] %v484_v41 }
 0x199   :  { %v390_v42 = vpop.f32.mrf.mxu2  ;;  %v455_v43 = vpop.f32.mrf.mxu3 }
 0x19a   :  { %v456_v44 = vadd.f32 %v455_v43, %v390_v42 }
 0x19c   :  { %v485_v45 = vadd.f32 %v858_v53, %v456_v44 }
 0x19e   :  { %501 = vst [vmem:[%s930_s6 + $0x68] sm:$0xff] %v485_v45 }
 0x1a1   :  { %v393_v46 = vpop.f32.mrf.mxu2  ;;  %v458_v47 = vpop.f32.mrf.mxu3 }
 0x1a2   :  { %v459_v48 = vadd.f32 %v458_v47, %v393_v46 }
 0x1a4   :  { %v486_v49 = vadd.f32 %v858_v53, %v459_v48 }
 0x1a6   :  { %502 = vst [vmem:[%s930_s6 + $0x70] sm:$0xff] %v486_v49 }
 0x1a9   :  { %v396_v50 = vpop.f32.mrf.mxu2  ;;  %v461_v51 = vpop.f32.mrf.mxu3 }
 0x1aa   :  { %v462_v52 = vadd.f32 %v461_v51, %v396_v50 }
 0x1ac   :  { %v487_v17 = vadd.f32 %v858_v53, %v462_v52 }
 0x1ae   :  { %503 = vst [vmem:[%s930_s6 + $0x78] sm:$0xff] %v487_v17 }
 0x1af   :  { %564 = vsyncpa [#allocation3], 1 }
 0x1b0   :  { %565 = vsyncpa [#allocation5], 1 }

</bundles_post_ra>
